<compile_context>
chip_gen: v6e
topology: v6e:2x2x1
jax: 0.10.0
libtpu: 0.0.40
codegen_flags: <defaults>
</compile_context>

<pallas_src>
import jax
import jax.numpy as jnp
from jax import lax
from jax.experimental import pallas as pl
from jax.experimental.pallas import tpu as pltpu

LANES = 128
TARGET_BLOCK_BYTES = 4 << 20     # ~4 MiB per input per grid step
ACC_ROWS_MAX = 2048              # fixed 1 MiB f32 accumulator


def _round_up(a, b):
    return ((a + b - 1) // b) * b


def _make_mse_kernel(block_rows, acc_rows, rows, inv_n):
    num_chunks = block_rows // acc_rows
    assert block_rows == num_chunks * acc_rows

    def kernel(x_ref, t_ref, o_ref, acc_ref):
        j = pl.program_id(0)
        row0 = j * block_rows

        @pl.when(j == 0)
        def _init():
            acc_ref[...] = jnp.zeros_like(acc_ref)

        is_full = row0 + block_rows <= rows  # block entirely inside real data

        def accumulate(masked):
            # Statically-unrolled loop over acc_rows-sized sub-chunks keeps the
            # accumulator fixed-size regardless of the (large) block size.
            for c in range(num_chunks):
                r0 = c * acc_rows
                xs = x_ref[pl.ds(r0, acc_rows), :].astype(jnp.float32)
                ts = t_ref[pl.ds(r0, acc_rows), :].astype(jnp.float32)
                d = xs - ts
                if masked:
                    # Select BEFORE squaring: Pallas-padded tail rows may hold
                    # garbage (Inf/NaN); where() must not propagate them.
                    ridx = lax.broadcasted_iota(jnp.int32, (acc_rows, LANES), 0)
                    d = jnp.where(ridx + (row0 + r0) < rows, d, 0.0)
                acc_ref[...] += d * d

        @pl.when(is_full)
        def _interior():
            accumulate(False)

        @pl.when(jnp.logical_not(is_full))
        def _tail():
            accumulate(True)

        @pl.when(j == pl.num_programs(0) - 1)
        def _finalize():
            # Single cross-lane reduce; fold in the / nelement() scale.
            o_ref[...] = jnp.reshape(jnp.sum(acc_ref[...]) * inv_n, (1, 1))

    return kernel


def _mse_prefix_pallas(x2, t2, inv_n):
    """sum((x2 - t2)**2) * inv_n over a (rows, 128) pair, via Pallas."""
    rows = x2.shape[0]
    x_item = int(jnp.dtype(x2.dtype).itemsize)
    t_item = int(jnp.dtype(t2.dtype).itemsize)

    if rows <= ACC_ROWS_MAX:
        block_rows = rows      # equals the full array dim -> always legal
        acc_rows = rows
    else:
        acc_rows = ACC_ROWS_MAX
        # ~4 MiB block for the narrower input dtype, as a multiple of acc_rows
        # so sub-chunking inside the kernel is exact.
        target_rows = max(TARGET_BLOCK_BYTES // (LANES * min(x_item, t_item)),
                          acc_rows)
        block_rows = min(_round_up(target_rows, acc_rows),
                         _round_up(rows, acc_rows))

    n_tiles = pl.cdiv(rows, block_rows)
    assert rows + block_rows < 2 ** 31  # int32 row-iota in the masked tail

    kernel = _make_mse_kernel(block_rows, acc_rows, rows, inv_n)

    # 2 inputs x 2 pipeline buffers + fixed accumulator, with headroom; capped
    # at 48 MiB (under v7x's 64 MiB physical VMEM, above v5e's 16 MiB default).
    vmem_need = 2 * block_rows * LANES * (x_item + t_item) + acc_rows * LANES * 4
    vmem_limit = int(min(max(vmem_need + (4 << 20), 32 << 20), 48 << 20))

    out = pl.pallas_call(
        kernel,
        out_shape=jax.ShapeDtypeStruct((1, 1), jnp.float32),
        grid_spec=pltpu.PrefetchScalarGridSpec(
            num_scalar_prefetch=0,
            grid=(n_tiles,),
            in_specs=[
                pl.BlockSpec((block_rows, LANES), lambda j: (j, 0)),
                pl.BlockSpec((block_rows, LANES), lambda j: (j, 0)),
            ],
            out_specs=pl.BlockSpec((1, 1), lambda j: (0, 0)),
            scratch_shapes=[pltpu.VMEM((acc_rows, LANES), jnp.float32)],
        ),
        compiler_params=pltpu.CompilerParams(
            dimension_semantics=("arbitrary",),
            vmem_limit_bytes=vmem_limit,
        ),
    )(x2, t2)
    return out[0, 0]


def mse_loss(x, target):
    """Equivalent of ((x - target) ** 2).sum() / x.nelement(), in f32."""
    assert x.shape == target.shape, (x.shape, target.shape)
    nelem = int(x.size)
    assert nelem > 0
    inv_n = 1.0 / nelem

    xf = jnp.ravel(x)        # free bitcast for contiguous inputs
    tf = jnp.ravel(target)

    rows = nelem // LANES
    rem = nelem - rows * LANES

    total = jnp.float32(0.0)
    if rows > 0:
        if rem:
            # Non-lane-multiple shape: kernel handles the multiple-of-128
            # prefix (one contiguous slice; no full-array zero-pad copies).
            xm = lax.slice(xf, (0,), (rows * LANES,))
            tm = lax.slice(tf, (0,), (rows * LANES,))
        else:
            xm, tm = xf, tf  # zero-copy reshape path (common case)
        total = total + _mse_prefix_pallas(
            xm.reshape(rows, LANES), tm.reshape(rows, LANES), inv_n)
    if rem:
        # <128-element ragged tail: tiny plain-JAX sum.
        xt = lax.slice(xf, (rows * LANES,), (nelem,)).astype(jnp.float32)
        tt = lax.slice(tf, (rows * LANES,), (nelem,)).astype(jnp.float32)
        dt = xt - tt
        total = total + jnp.sum(dt * dt) * jnp.float32(inv_n)
    return total


if __name__ == "__main__":
    key = jax.random.PRNGKey(0)
    k1, k2 = jax.random.split(key)
    # Small NCHW-shaped inputs, consistent with a detection-loss use case.
    x = jax.random.normal(k1, (2, 4, 16, 16), dtype=jnp.float32)
    t = jax.random.normal(k2, (2, 4, 16, 16), dtype=jnp.float32)

    out = jax.block_until_ready(mse_loss(x, t))

    # Reference check in plain JAX.
    ref = jnp.sum((x - t) ** 2) / x.size
    assert jnp.allclose(out, ref, rtol=1e-5, atol=1e-6), (out, ref)

    print("KERNEL_OK")
</pallas_src>

<mosaic_0001>
module attributes {stable_mosaic.version = 11 : i64} {
  func.func @kernel(%arg0: i32, %arg1: memref<16x128xf32, #tpu.memory_space<vmem>>, %arg2: memref<16x128xf32, #tpu.memory_space<vmem>>, %arg3: memref<1x1xf32, #tpu.memory_space<vmem>>, %arg4: memref<16x128xf32, #tpu.memory_space<vmem>>) attributes {dimension_semantics = [#tpu.dimension_semantics<arbitrary>], iteration_bounds = array<i64: 1>, scalar_prefetch = 0 : i64, scratch_operands = 1 : i64, tpu.core_type = #tpu.core_type<tc>, window_params = [{transform_indices = @transform_0, window_bounds = array<i64: 16, 128>}, {transform_indices = @transform_1, window_bounds = array<i64: 16, 128>}, {pipeline_mode = #tpu.pipeline_mode<synchronous>, transform_indices = @transform_2, window_bounds = array<i64: 1, 1>}]} {
    %c16_i32 = arith.constant 16 : i32
    %0 = arith.muli %arg0, %c16_i32 : i32
    %c0_i32 = arith.constant 0 : i32
    %1 = arith.cmpi eq, %arg0, %c0_i32 : i32
    %2 = arith.extui %1 : i1 to i32
    %c0_i32_0 = arith.constant 0 : i32
    %3 = arith.cmpi ne, %2, %c0_i32_0 : i32
    scf.if %3 {
      %cst = arith.constant 0.000000e+00 : f32
      %14 = vector.broadcast %cst : f32 to vector<16x128xf32>
      %c0 = arith.constant 0 : index
      %c0_7 = arith.constant 0 : index
      %15 = vector.load %arg4[%c0, %c0_7] : memref<16x128xf32, #tpu.memory_space<vmem>>, vector<16x128xf32>
      tpu.vector_store %arg4[%c0, %c0_7], %14 {strides = array<i32>} : memref<16x128xf32, #tpu.memory_space<vmem>>, vector<16x128xf32>,
    } else {
    }
    %c16_i32_1 = arith.constant 16 : i32
    %4 = arith.addi %0, %c16_i32_1 : i32
    %c16_i32_2 = arith.constant 16 : i32
    %5 = arith.cmpi sle, %4, %c16_i32_2 : i32
    %6 = arith.extui %5 : i1 to i32
    %c0_i32_3 = arith.constant 0 : i32
    %7 = arith.cmpi ne, %6, %c0_i32_3 : i32
    scf.if %7 {
      %c0 = arith.constant 0 : index
      %c0_7 = arith.constant 0 : index
      %14 = vector.load %arg1[%c0, %c0_7] : memref<16x128xf32, #tpu.memory_space<vmem>>, vector<16x128xf32>
      %c0_8 = arith.constant 0 : index
      %c0_9 = arith.constant 0 : index
      %15 = vector.load %arg2[%c0_8, %c0_9] : memref<16x128xf32, #tpu.memory_space<vmem>>, vector<16x128xf32>
      %16 = arith.subf %14, %15 : vector<16x128xf32>
      %c0_10 = arith.constant 0 : index
      %c0_11 = arith.constant 0 : index
      %17 = vector.load %arg4[%c0_10, %c0_11] : memref<16x128xf32, #tpu.memory_space<vmem>>, vector<16x128xf32>
      %18 = arith.mulf %16, %16 : vector<16x128xf32>
      %19 = arith.addf %17, %18 : vector<16x128xf32>
      %c0_12 = arith.constant 0 : index
      %c0_13 = arith.constant 0 : index
      %20 = vector.load %arg4[%c0_12, %c0_13] : memref<16x128xf32, #tpu.memory_space<vmem>>, vector<16x128xf32>
      tpu.vector_store %arg4[%c0_12, %c0_13], %19 {strides = array<i32>} : memref<16x128xf32, #tpu.memory_space<vmem>>, vector<16x128xf32>,
    } else {
    }
    %true = arith.constant true
    %8 = arith.xori %5, %true : i1
    %9 = arith.extui %8 : i1 to i32
    %c0_i32_4 = arith.constant 0 : i32
    %10 = arith.cmpi ne, %9, %c0_i32_4 : i32
    scf.if %10 {
      %c0 = arith.constant 0 : index
      %c0_7 = arith.constant 0 : index
      %14 = vector.load %arg1[%c0, %c0_7] : memref<16x128xf32, #tpu.memory_space<vmem>>, vector<16x128xf32>
      %c0_8 = arith.constant 0 : index
      %c0_9 = arith.constant 0 : index
      %15 = vector.load %arg2[%c0_8, %c0_9] : memref<16x128xf32, #tpu.memory_space<vmem>>, vector<16x128xf32>
      %16 = arith.subf %14, %15 : vector<16x128xf32>
      %17 = tpu.iota {dimensions = array<i32: 0>} : vector<16x128xi32>
      %c0_i32_10 = arith.constant 0 : i32
      %18 = arith.addi %0, %c0_i32_10 : i32
      %19 = vector.broadcast %18 : i32 to vector<16x128xi32>
      %20 = arith.addi %17, %19 : vector<16x128xi32>
      %c16_i32_11 = arith.constant 16 : i32
      %21 = vector.broadcast %c16_i32_11 : i32 to vector<16x128xi32>
      %22 = arith.cmpi slt, %20, %21 : vector<16x128xi32>
      %cst = arith.constant 0.000000e+00 : f32
      %23 = vector.broadcast %cst : f32 to vector<16x128xf32>
      %24 = arith.select %22, %16, %23 : vector<16x128xi1>, vector<16x128xf32>
      %c0_12 = arith.constant 0 : index
      %c0_13 = arith.constant 0 : index
      %25 = vector.load %arg4[%c0_12, %c0_13] : memref<16x128xf32, #tpu.memory_space<vmem>>, vector<16x128xf32>
      %26 = arith.mulf %24, %24 : vector<16x128xf32>
      %27 = arith.addf %25, %26 : vector<16x128xf32>
      %c0_14 = arith.constant 0 : index
      %c0_15 = arith.constant 0 : index
      %28 = vector.load %arg4[%c0_14, %c0_15] : memref<16x128xf32, #tpu.memory_space<vmem>>, vector<16x128xf32>
      tpu.vector_store %arg4[%c0_14, %c0_15], %27 {strides = array<i32>} : memref<16x128xf32, #tpu.memory_space<vmem>>, vector<16x128xf32>,
    } else {
    }
    %c0_i32_5 = arith.constant 0 : i32
    %11 = arith.cmpi eq, %arg0, %c0_i32_5 : i32
    %12 = arith.extui %11 : i1 to i32
    %c0_i32_6 = arith.constant 0 : i32
    %13 = arith.cmpi ne, %12, %c0_i32_6 : i32
    scf.if %13 {
      %c0 = arith.constant 0 : index
      %c0_7 = arith.constant 0 : index
      %14 = vector.load %arg4[%c0, %c0_7] : memref<16x128xf32, #tpu.memory_space<vmem>>, vector<16x128xf32>
      %15 = vector.shape_cast %14 : vector<16x128xf32> to vector<1x16x128xf32>
      %cst = arith.constant dense<0.000000e+00> : vector<1xf32>
      %16 = vector.multi_reduction <add>, %15, %cst [1, 2] : vector<1x16x128xf32> to vector<1xf32>
      %17 = vector.shape_cast %16 : vector<1xf32> to vector<1x1x1xf32>
      %18 = vector.extract %17[0, 0, 0] : f32 from vector<1x1x1xf32>
      %cst_8 = arith.constant 4.8828125E-4 : f32
      %19 = arith.mulf %18, %cst_8 : f32
      %20 = vector.broadcast %19 : f32 to vector<1x1xf32>
      %c0_9 = arith.constant 0 : index
      %c0_10 = arith.constant 0 : index
      %21 = vector.load %arg3[%c0_9, %c0_10] : memref<1x1xf32, #tpu.memory_space<vmem>>, vector<1x1xf32>
      tpu.vector_store %arg3[%c0_9, %c0_10], %20 {strides = array<i32>} : memref<1x1xf32, #tpu.memory_space<vmem>>, vector<1x1xf32>,
    } else {
    }
    return
  }
  func.func @transform_0(%arg0: i32) -> (i32, i32) {
    %c0_i32 = arith.constant 0 : i32
    %c0_i32_0 = arith.constant 0 : i32
    return %arg0, %c0_i32 : i32, i32
  }
  func.func @transform_1(%arg0: i32) -> (i32, i32) {
    %c0_i32 = arith.constant 0 : i32
    %c0_i32_0 = arith.constant 0 : i32
    return %arg0, %c0_i32 : i32, i32
  }
  func.func @transform_2(%arg0: i32) -> (i32, i32) {
    %c0_i32 = arith.constant 0 : i32
    %c0_i32_0 = arith.constant 0 : i32
    %c0_i32_1 = arith.constant 0 : i32
    return %c0_i32, %c0_i32_0 : i32, i32
  }
}

</mosaic_0001>

<bundles_post_ra>
// kernel: tpu_custom_call.1
= control target key start
LH: loop header
LB: loop body
LE: loop exit
PB: predicated region body
PF: predicated region fallthrough
CT: control target
= control target key end

     0   :  { %7 = vsyncpa [#allocation4], 0  ;;  %s231_s0 = inlined_call_operand.hbm [shape: f32[16,128], index: 0, kind: input, shape index: {}]   ;;  %s232_s1 = inlined_call_operand.hbm [shape: f32[16,128], index: 1, kind: input, shape index: {}]   ;;  %s233_s2 = inlined_call_operand.hbm [shape: f32[1,1], index: 2, kind: output, shape index: {}]  }
   0x1   :  { %8 = vsyncpa [#allocation7], 0 }
   0x2   :  { %9 = vsyncpa [#allocation5], 0  ;;  %s202_s9 = smov [#allocation3]  }
   0x3   :  { %s15_s10 = sshll.u32 %s202_s9, 4  ;;  %s16_s10 = int_to_ptr.vmem [resolvable:$true] %s15_s10 }
   0x4   :  { %s144_s11 = scalar_lea.vmem %s16_s10, 256  ;;  %p149_p1 = scmp.lt.s32.totalorder %s16_s10, %s16_s10 }
   0x5   :  { %p145_p0 = scmp.ne.s32.totalorder %s16_s10, %s144_s11  ;;  %p150_p2 = scmp.lt.s32.totalorder %s144_s11, %s144_s11 }
   0x7   :  { %p151_p3 = por %p150_p2, %p149_p1 }
   0x9   :  { %p152_p4 = pnand %p151_p3, %p145_p0 }
   0xb   :  { %155 = shalt.err (!%p152_p4)
}
   0xc   :  { %s203_s12 = smov 128   ;;  %s204_s13 = smov 8  }
   0xd   :  { %21 = dma.hbm_to_vmem [thread:$0]  %s231_s0, 256, %s16_s10, [#allocation4], %s203_s12, %s203_s12, %s204_s13  }
   0xe   :  { %s205_s16 = smov [#allocation6]  }
   0xf   :  { %s27_s17 = sshll.u32 %s205_s16, 4  ;;  %s28_s17 = int_to_ptr.vmem [resolvable:$true] %s27_s17 }
  0x10   :  { %s164_s18 = scalar_lea.vmem %s28_s17, 256  ;;  %p169_p6 = scmp.lt.s32.totalorder %s28_s17, %s28_s17 }
  0x11   :  { %p165_p5 = scmp.ne.s32.totalorder %s28_s17, %s164_s18  ;;  %p170_p7 = scmp.lt.s32.totalorder %s164_s18, %s164_s18 }
  0x13   :  { %p171_p8 = por %p170_p7, %p169_p6 }
  0x15   :  { %p172_p9 = pnand %p171_p8, %p165_p5 }
  0x17   :  { %175 = shalt.err (!%p172_p9)
}
  0x18   :  { %33 = dma.hbm_to_vmem [thread:$0]  %s232_s1, 256, %s28_s17, [#allocation7], %s203_s12, %s203_s12, %s204_s13  }
  0x19   :  { %196 = dma.done.wait [#allocation4], 256  }
  0x1a   :  { %197 = vsyncadd [#allocation4], 4294967040 }
  0x1b   :  { %198 = dma.done.wait [#allocation7], 256  }
  0x1c   :  { %199 = vsyncadd [#allocation7], 4294967040  ;;  %v52_v0 = vld [vmem:[#allocation3] sm:$0xff]  ;;  %v53_v1 = vld [vmem:[#allocation3 + $0x8] sm:$0xff]  ;;  %s206_s0 = smov [#allocation8]   ;;  %vm111_vm0 = vcmask 0  }
  0x1d   :  { %v54_v2 = vld [vmem:[#allocation6] sm:$0xff]  ;;  %v55_v3 = vld [vmem:[#allocation6 + $0x8] sm:$0xff]  ;;  %s119_s1 = sshll.u32 %s206_s0, 4  ;;  %s120_s1 = int_to_ptr.vmem [resolvable:$true] %s119_s1 }
  0x1e   :  { %v56_v4 = vsub.f32 %v52_v0, %v54_v2  ;;  %v57_v5 = vsub.f32 %v53_v1, %v55_v3  ;;  %s176_s23 = scalar_lea.vmem %s120_s1, 16  ;;  %s180_s24 = scalar_lea.vmem %s120_s1, 32 }
  0x1f   :  { %p177_p10 = scmp.ne.s32.totalorder %s120_s1, %s176_s23  ;;  %p181_p11 = scmp.lt.s32.totalorder %s120_s1, %s120_s1 }
  0x20   :  { %v60_v6 = vmul.f32 %v56_v4, %v56_v4  ;;  %v61_v7 = vmul.f32 %v57_v5, %v57_v5  ;;  %p182_p12 = scmp.lt.s32.totalorder %s180_s24, %s176_s23 }
  0x22   :  { %v99_v8 = vadd.f32 %v61_v7, %v60_v6  ;;  %p183_p13 = por %p182_p12, %p181_p11 }
  0x24   :  { %100 = vadd.xlane.f32.xlu0 %v99_v8  ;;  %p184_p0 = pnand %p183_p13, %p177_p10 }
  0xad   :  { %v101_v9 = vpop.xlane.xlu0 %100 }
  0xae   :  { %v102_v10 = vrot.slane %v101_v9, 4 }
  0xb0   :  { %v103_v11 = vadd.f32 %v102_v10, %v101_v9 }
  0xb2   :  { %v104_v12 = vrot.slane %v103_v11, 2 }
  0xb4   :  { %v105_v13 = vadd.f32 %v104_v12, %v103_v11 }
  0xb6   :  { %v106_v14 = vrot.slane %v105_v13, 1 }
  0xb8   :  { %v107_v15 = vadd.f32 %v106_v14, %v105_v13 }
  0xba   :  { %129 = vpush %v107_v15 }
  0xeb   :  { %s130_s21 = spop %129 }
  0xec   :  { %s109_s22 = smul.f32 0.00048828125, %s130_s21 }
  0xee   :  { %v110_v16 = vstv %s109_s22 }
  0xef   :  { %112 = vst.msk [vmem:[#allocation8] sm:$0x1] %vm111_vm0, %v110_v16 }
  0xf0   :  { %187 = shalt.err (!%p184_p0)
}
  0xf1   :  { %122 = dma.vmem_to_hbm [thread:$0]  %s120_s1, 16, %s233_s2, [#allocation5]  }
  0xf2   :  { %200 = dma.done.wait [#allocation5], 16  }
  0xf3   :  { %201 = vsyncadd [#allocation5], 4294967280 }
  0xf4   :  { %126 = vsyncpa [#allocation4], 1 }
  0xf5   :  { %127 = vsyncpa [#allocation7], 1 }
  0xf6   :  { %128 = vsyncpa [#allocation5], 1 }

</bundles_post_ra>
